<compile_context>
chip_gen: v7x
topology: tpu7x:2x2x1
jax: 0.10.0
libtpu: 0.0.40
codegen_flags: <defaults>
</compile_context>

<pallas_src>
import numpy as np
import jax
import jax.numpy as jnp
from jax.experimental import pallas as pl
from jax.experimental.pallas import tpu as pltpu


# ----------------------------------------------------------------------------
# db3 filter bank (pywt convention: dec_* for analysis, rec_* for synthesis)
# ----------------------------------------------------------------------------
_DB3_DEC_LO = np.array([0.035226291882100656, -0.08544127388224149,
                        -0.13501102001039084, 0.4598775021193313,
                        0.8068915093133388, 0.3326705529509569], np.float64)
_DB3_DEC_HI = np.array([-0.3326705529509569, 0.8068915093133388,
                        -0.4598775021193313, -0.13501102001039084,
                        0.08544127388224149, 0.035226291882100656], np.float64)
_DB3_REC_LO = _DB3_DEC_LO[::-1].copy()
_DB3_REC_HI = _DB3_DEC_HI[::-1].copy()


def _analysis_matrix(seq_len, dec_filt):
    """M (seq_len, outsize) s.t. coeffs = x @ M reproduces pytorch_wavelets
    afb1d with mode='zero' (stride-2 cross-correlation, symmetric zero pad)."""
    L = len(dec_filt)                       # 6 for db3
    outsize = (seq_len + L - 1) // 2        # pywt.dwt_coeff_len(.., mode='zero')
    p = 2 * (outsize - 1) - seq_len + L     # total zero padding
    # TODO(synk): odd seq_len needs the extra one-sided pre-pad of the reference.
    assert p % 2 == 0, "use an even seq_len"
    pad = p // 2
    h_rev = dec_filt[::-1]                  # conv2d is cross-corr; the lib
    M = np.zeros((seq_len, outsize), np.float64)   # pre-reverses the filter
    for k in range(outsize):
        for j in range(L):
            i = 2 * k + j - pad
            if 0 <= i < seq_len:
                M[i, k] += h_rev[j]
    return M


def _synthesis_matrix(coeff_len, out_len, rec_filt):
    """S (coeff_len, out_len) s.t. y = c @ S reproduces pytorch_wavelets sfb1d
    with mode='zero' (stride-2 conv_transpose, padding L-2)."""
    L = len(rec_filt)
    S = np.zeros((coeff_len, out_len), np.float64)
    for k in range(coeff_len):
        for t in range(L):
            m = 2 * k + t - (L - 2)
            if 0 <= m < out_len:
                S[k, m] += rec_filt[t]
    return S


def build_params(seq_len, pred_len, w_yl, b_yl, w_yh, b_yh):
    """Pre-fold the entire linear chain:
         pred = xn @ (mlo @ W_yl^T @ slo + mhi @ W_yh^T @ shi)
                   + (b_yl @ slo + b_yh @ shi)
       Kernel needs only A^T (pred_len, seq_len) [bf16] and c^T (pred_len, 1)."""
    lc_out = pred_len // 2 + 2
    mlo = _analysis_matrix(seq_len, _DB3_DEC_LO)            # (L, lc_in)
    mhi = _analysis_matrix(seq_len, _DB3_DEC_HI)
    slo = _synthesis_matrix(lc_out, pred_len, _DB3_REC_LO)  # (lc_out, P)
    shi = _synthesis_matrix(lc_out, pred_len, _DB3_REC_HI)

    wylT = np.asarray(w_yl, np.float64).T                   # (lc_in, lc_out)
    wyhT = np.asarray(w_yh, np.float64).T
    byl = np.asarray(b_yl, np.float64).reshape(1, -1)       # (1, lc_out)
    byh = np.asarray(b_yh, np.float64).reshape(1, -1)

    A = mlo @ wylT @ slo + mhi @ wyhT @ shi                 # (L, P)
    c = byl @ slo + byh @ shi                               # (1, P)

    return dict(
        a_t=jnp.asarray(A.T, jnp.bfloat16),                 # (P, L)  single-pass MXU
        c_t=jnp.asarray(c.T, jnp.float32),                  # (P, 1)
    )


# ----------------------------------------------------------------------------
# Kernel bodies
# ----------------------------------------------------------------------------
def _wt2_body(x, a, c):
    """x: (seq_len, R) f32; a: (pred_len, seq_len) bf16; c: (pred_len, 1) f32."""
    seq_len = x.shape[0]
    # instance norm stats over time (torch: unbiased var, eps inside sqrt)
    mean = jnp.mean(x, axis=0, keepdims=True)                        # (1, R)
    xc = x - mean
    var = jnp.sum(xc * xc, axis=0, keepdims=True) / (seq_len - 1)
    stdev = jnp.sqrt(var + 1e-5)                                     # (1, R)
    # Norm fold:  (A^T @ (xc/std) + c) * std + mean == A^T @ xc + c*std + mean
    acc = jnp.dot(a, xc.astype(a.dtype), preferred_element_type=jnp.float32)
    return acc + c * stdev + mean                                    # (P, R)


def wt2_kernel_rows(x_ref, a_ref, c_ref, out_ref):
    """Transposed-slab path: blocks (seq_len, R) -> (pred_len, R)."""
    out_ref[...] = _wt2_body(x_ref[...].astype(jnp.float32),
                             a_ref[...], c_ref[...])


def wt2_kernel_feat(x_ref, a_ref, c_ref, out_ref):
    """Native-layout path: blocks (1, seq_len, T) -> (1, pred_len, T)."""
    out_ref[0] = _wt2_body(x_ref[0].astype(jnp.float32),
                           a_ref[...], c_ref[...])


# ----------------------------------------------------------------------------
# Wrapper mirroring WT2.forward(x, x_stamp, y, y_stamp)
# ----------------------------------------------------------------------------
def _round_up(a, m):
    return (a + m - 1) // m * m


_VMEM_LIMIT = 48 * 1024 * 1024   # > v5e default (16 MiB), < v7x physical (64 MiB/TC)


def wt2_forward(x, x_stamp, y, y_stamp, params, pred_len, *, lane_tile=1024):
    del x_stamp, y, y_stamp          # unused by the PyTorch forward as well
    b, seq_len, n = x.shape
    a_t, c_t = params["a_t"], params["c_t"]

    cost = pl.CostEstimate(
        flops=2 * pred_len * seq_len * b * n,
        transcendentals=b * n,
        bytes_accessed=4 * (seq_len + pred_len) * b * n + 2 * pred_len * seq_len)

    if n >= 128:
        # ---- native layout: zero wrapper transposes, lane-dense blocks ------
        n_tile = min(lane_tile, (n // 128) * 128)
        if b == 1 and n >= 256:          # keep >= 2 grid steps for v7x megacore
            n_tile = min(n_tile, _round_up(pl.cdiv(n, 2), 128))
        grid = (b, pl.cdiv(n, n_tile))   # ragged last feature block is fine
        return pl.pallas_call(
            wt2_kernel_feat,
            out_shape=jax.ShapeDtypeStruct((b, pred_len, n), jnp.float32),
            grid_spec=pltpu.PrefetchScalarGridSpec(
                num_scalar_prefetch=0,
                grid=grid,
                in_specs=[
                    pl.BlockSpec((1, seq_len, n_tile), lambda i, j: (i, 0, j)),
                    pl.BlockSpec(a_t.shape, lambda i, j: (0, 0)),  # VMEM-resident
                    pl.BlockSpec(c_t.shape, lambda i, j: (0, 0)),  # VMEM-resident
                ],
                out_specs=pl.BlockSpec((1, pred_len, n_tile),
                                       lambda i, j: (i, 0, j)),
            ),
            compiler_params=pltpu.CompilerParams(
                dimension_semantics=("parallel", "parallel"),
                vmem_limit_bytes=_VMEM_LIMIT),
            cost_estimate=cost,
        )(x, a_t, c_t)

    # ---- small-feature fallback: transposed slab keeps lanes dense ----------
    # TODO(synk): fold this (B,L,N)->(L,B*N) shuffle into the kernel (XLU) to
    # drop the two extra HBM passes when N < 128.
    rows = b * n
    x_slab = jnp.transpose(x, (1, 0, 2)).reshape(seq_len, rows)

    if rows < 128:
        row_tile = rows                           # lane block == full array dim
    else:
        row_tile = min(lane_tile, (rows // 128) * 128)
        if rows >= 256:                           # >= 2 grid steps for v7x
            row_tile = min(row_tile, _round_up(pl.cdiv(rows, 2), 128))
    grid = (pl.cdiv(rows, row_tile),)             # ragged last block, no jnp.pad

    out = pl.pallas_call(
        wt2_kernel_rows,
        out_shape=jax.ShapeDtypeStruct((pred_len, rows), jnp.float32),
        grid_spec=pltpu.PrefetchScalarGridSpec(
            num_scalar_prefetch=0,
            grid=grid,
            in_specs=[
                pl.BlockSpec((seq_len, row_tile), lambda i: (0, i)),
                pl.BlockSpec(a_t.shape, lambda i: (0, 0)),   # VMEM-resident
                pl.BlockSpec(c_t.shape, lambda i: (0, 0)),   # VMEM-resident
            ],
            out_specs=pl.BlockSpec((pred_len, row_tile), lambda i: (0, i)),
        ),
        compiler_params=pltpu.CompilerParams(
            dimension_semantics=("parallel",),
            vmem_limit_bytes=_VMEM_LIMIT),
        cost_estimate=cost,
    )(x_slab, a_t, c_t)

    return jnp.transpose(out.reshape(pred_len, b, n), (1, 0, 2))    # (b, P, n)


# ----------------------------------------------------------------------------
# Unfolded f64 NumPy reference (same wavelet matrices, un-fused chain)
# ----------------------------------------------------------------------------
def _reference_forward(x, w_yl, b_yl, w_yh, b_yh, pred_len):
    x = np.asarray(x, np.float64)
    _, seq_len, _ = x.shape
    mean = x.mean(axis=1, keepdims=True)
    xc = x - mean
    stdev = np.sqrt(xc.var(axis=1, keepdims=True, ddof=1) + 1e-5)
    xn = xc / stdev
    xt = np.transpose(xn, (0, 2, 1))                          # (B, N, L)
    lc_out = pred_len // 2 + 2
    mlo = _analysis_matrix(seq_len, _DB3_DEC_LO)
    mhi = _analysis_matrix(seq_len, _DB3_DEC_HI)
    slo = _synthesis_matrix(lc_out, pred_len, _DB3_REC_LO)
    shi = _synthesis_matrix(lc_out, pred_len, _DB3_REC_HI)
    yl = xt @ mlo
    yh = xt @ mhi
    yl_p = yl @ np.asarray(w_yl, np.float64).T + np.asarray(b_yl, np.float64)
    yh_p = yh @ np.asarray(w_yh, np.float64).T + np.asarray(b_yh, np.float64)
    pred = np.transpose(yl_p @ slo + yh_p @ shi, (0, 2, 1))   # (B, P, N)
    return pred * stdev + mean


def _run_case(b, seq_len, n_feat, pred_len, seed):
    lc_in = seq_len // 2 + 2
    lc_out = pred_len // 2 + 2
    key = jax.random.PRNGKey(seed)
    k1, k2, k3, k4, kp = jax.random.split(key, 5)
    x = jax.random.normal(k1, (b, seq_len, n_feat), jnp.float32)
    x_stamp = jax.random.normal(k2, (b, seq_len, 4), jnp.float32)   # unused
    y = jax.random.normal(k3, (b, pred_len, n_feat), jnp.float32)   # unused
    y_stamp = jax.random.normal(k4, (b, pred_len, 4), jnp.float32)  # unused

    # deterministic Linear params (nn.Linear-style uniform(-1/sqrt(in), 1/sqrt(in)))
    bound = 1.0 / np.sqrt(lc_in)
    kw1, kb1, kw2, kb2 = jax.random.split(kp, 4)
    w_yh = jax.random.uniform(kw1, (lc_out, lc_in), jnp.float32, -bound, bound)
    b_yh = jax.random.uniform(kb1, (lc_out,), jnp.float32, -bound, bound)
    w_yl = jax.random.uniform(kw2, (lc_out, lc_in), jnp.float32, -bound, bound)
    b_yl = jax.random.uniform(kb2, (lc_out,), jnp.float32, -bound, bound)

    params = build_params(seq_len, pred_len,
                          np.asarray(w_yl), np.asarray(b_yl),
                          np.asarray(w_yh), np.asarray(b_yh))

    pred = wt2_forward(x, x_stamp, y, y_stamp, params, pred_len)
    pred = np.asarray(jax.block_until_ready(pred))
    assert pred.shape == (b, pred_len, n_feat), pred.shape
    assert np.all(np.isfinite(pred))

    ref = _reference_forward(np.asarray(x), np.asarray(w_yl), np.asarray(b_yl),
                             np.asarray(w_yh), np.asarray(b_yh), pred_len)
    # bf16 operand / folded-operator drift -> loose tolerance
    np.testing.assert_allclose(pred, ref, rtol=1e-1, atol=1e-1)


if __name__ == "__main__":
    _run_case(b=2, seq_len=16, n_feat=4, pred_len=8, seed=0)     # small-N slab path
    _run_case(b=2, seq_len=16, n_feat=128, pred_len=8, seed=0)   # native lane-dense path
    print("KERNEL_OK")
</pallas_src>

<mosaic_0001>
module attributes {stable_mosaic.version = 11 : i64} {
  func.func @wt2_kernel_rows(%arg0: i32, %arg1: memref<16x8xf32, #tpu.memory_space<vmem>>, %arg2: memref<8x16xbf16, #tpu.memory_space<vmem>>, %arg3: memref<8x1xf32, #tpu.memory_space<vmem>>, %arg4: memref<8x8xf32, #tpu.memory_space<vmem>>) attributes {dimension_semantics = [#tpu.dimension_semantics<parallel>], iteration_bounds = array<i64: 1>, scalar_prefetch = 0 : i64, scratch_operands = 0 : i64, tpu.core_type = #tpu.core_type<tc>, window_params = [{transform_indices = @transform_0, window_bounds = array<i64: 16, 8>}, {pipeline_mode = #tpu.pipeline_mode<synchronous>, transform_indices = @transform_1, window_bounds = array<i64: 8, 16>}, {pipeline_mode = #tpu.pipeline_mode<synchronous>, transform_indices = @transform_2, window_bounds = array<i64: 8, 1>}, {transform_indices = @transform_3, window_bounds = array<i64: 8, 8>}]} {
    %c0 = arith.constant 0 : index
    %c0_0 = arith.constant 0 : index
    %0 = vector.load %arg1[%c0, %c0_0] : memref<16x8xf32, #tpu.memory_space<vmem>>, vector<16x8xf32>
    %c0_1 = arith.constant 0 : index
    %c0_2 = arith.constant 0 : index
    %1 = vector.load %arg2[%c0_1, %c0_2] : memref<8x16xbf16, #tpu.memory_space<vmem>>, vector<8x16xbf16>
    %c0_3 = arith.constant 0 : index
    %c0_4 = arith.constant 0 : index
    %2 = vector.load %arg3[%c0_3, %c0_4] : memref<8x1xf32, #tpu.memory_space<vmem>>, vector<8x1xf32>
    %cst = arith.constant dense<0.000000e+00> : vector<8xf32>
    %3 = vector.multi_reduction <add>, %0, %cst [0] : vector<16x8xf32> to vector<8xf32>
    %4 = vector.shape_cast %3 : vector<8xf32> to vector<1x8xf32>
    %cst_5 = arith.constant 1.600000e+01 : f32
    %5 = vector.broadcast %cst_5 : f32 to vector<1x8xf32>
    %6 = arith.divf %4, %5 : vector<1x8xf32>
    %7 = vector.broadcast %6 : vector<1x8xf32> to vector<16x8xf32>
    %8 = arith.subf %0, %7 : vector<16x8xf32>
    %9 = arith.mulf %8, %8 : vector<16x8xf32>
    %cst_6 = arith.constant dense<0.000000e+00> : vector<8xf32>
    %10 = vector.multi_reduction <add>, %9, %cst_6 [0] : vector<16x8xf32> to vector<8xf32>
    %11 = vector.shape_cast %10 : vector<8xf32> to vector<1x8xf32>
    %cst_7 = arith.constant 1.500000e+01 : f32
    %12 = vector.broadcast %cst_7 : f32 to vector<1x8xf32>
    %13 = arith.divf %11, %12 : vector<1x8xf32>
    %cst_8 = arith.constant 9.99999974E-6 : f32
    %14 = vector.broadcast %cst_8 : f32 to vector<1x8xf32>
    %15 = arith.addf %13, %14 : vector<1x8xf32>
    %16 = math.sqrt %15 : vector<1x8xf32>
    %17 = arith.truncf %8 : vector<16x8xf32> to vector<16x8xbf16>
    %cst_9 = arith.constant dense<0.000000e+00> : vector<8x8xf32>
    %18 = tpu.matmul %1, %17, %cst_9 {dimension_numbers = #tpu.dot_dimension_numbers<[1], [0], [0], [1], [0, 0, 1, 1], [], []>} : vector<8x16xbf16>, vector<16x8xbf16>, vector<8x8xf32> -> vector<8x8xf32>
    %19 = vector.broadcast %2 : vector<8x1xf32> to vector<8x8xf32>
    %20 = vector.broadcast %16 : vector<1x8xf32> to vector<8x8xf32>
    %21 = arith.mulf %19, %20 : vector<8x8xf32>
    %22 = arith.addf %18, %21 : vector<8x8xf32>
    %23 = vector.broadcast %6 : vector<1x8xf32> to vector<8x8xf32>
    %24 = arith.addf %22, %23 : vector<8x8xf32>
    %c0_10 = arith.constant 0 : index
    %c0_11 = arith.constant 0 : index
    %25 = vector.load %arg4[%c0_10, %c0_11] : memref<8x8xf32, #tpu.memory_space<vmem>>, vector<8x8xf32>
    tpu.vector_store %arg4[%c0_10, %c0_11], %24 {strides = array<i32>} : memref<8x8xf32, #tpu.memory_space<vmem>>, vector<8x8xf32>,
    return
  }
  func.func @transform_0(%arg0: i32) -> (i32, i32) {
    %c0_i32 = arith.constant 0 : i32
    %c0_i32_0 = arith.constant 0 : i32
    return %c0_i32, %arg0 : i32, i32
  }
  func.func @transform_1(%arg0: i32) -> (i32, i32) {
    %c0_i32 = arith.constant 0 : i32
    %c0_i32_0 = arith.constant 0 : i32
    %c0_i32_1 = arith.constant 0 : i32
    return %c0_i32, %c0_i32_0 : i32, i32
  }
  func.func @transform_2(%arg0: i32) -> (i32, i32) {
    %c0_i32 = arith.constant 0 : i32
    %c0_i32_0 = arith.constant 0 : i32
    %c0_i32_1 = arith.constant 0 : i32
    return %c0_i32, %c0_i32_0 : i32, i32
  }
  func.func @transform_3(%arg0: i32) -> (i32, i32) {
    %c0_i32 = arith.constant 0 : i32
    %c0_i32_0 = arith.constant 0 : i32
    return %c0_i32, %arg0 : i32, i32
  }
}

</mosaic_0001>

<bundles_post_ra>
// kernel: tpu_custom_call.1
= control target key start
LH: loop header
LB: loop body
LE: loop exit
PB: predicated region body
PF: predicated region fallthrough
CT: control target
= control target key end

     0   :  { %vm20_vm0 = vcmask 64512   ;;  %v162_v2 = vmov 0.0   ;;  %vm163_vm1 = vmmov 0   ;;  %v164_v7 = vmov 0   ;;  %s215_s0 = inlined_call_operand.vmem [shape: f32[16,8], index: 0, kind: input, shape index: {}]   ;;  %s216_s1 = inlined_call_operand.vmem [shape: bf16[8,16], index: 1, kind: input, shape index: {}]   ;;  %s217_s2 = inlined_call_operand.vmem [shape: f32[8,1], index: 2, kind: input, shape index: {}]   ;;  %s218_s3 = inlined_call_operand.hbm [shape: f32[8,8], index: 3, kind: output, shape index: {}]  }
   0x1   :  { %v16_v0 = vld [vmem:[%s215_s0] sm:$0xff]  ;;  %v17_v1 = vld [vmem:[%s215_s0 + $0x8] sm:$0xff]  ;;  %125 = vmatprep.subr.bf16.mxu0 %v162_v2  ;;  %127 = vmatprep.mubr.msk.bf16.mxu0 %vm163_vm1, %v162_v2 }
   0x2   :  { %v21_v3 = vsel %vm20_vm0, %v16_v0, 0.0  ;;  %v22_v4 = vsel %vm20_vm0, %v17_v1, 0.0  ;;  %v19_v5 = vld [vmem:[%s217_s2] sm:$0xff]  ;;  %135 = vset.pattern.permute.xlu0 %v164_v7 }
   0x3   :  { %v23_v6 = vadd.f32 %v22_v4, %v21_v3 }
   0x4   :  { %8 = vsyncpa [#allocation3], 0  ;;  %58 = vperm.xlu0 %135, %v19_v5   ;;  %v18_v22 = vld [vmem:[%s216_s1] sm:$0xf]  ;;  %vm62_vm2 = vcmask 130048   ;;  %s165_s1 = smov [#allocation2]  }
   0x5   :  { %v24_v8 = vrot.slane %v23_v6, 4  ;;  %s114_s18 = sshll.u32 %s165_s1, 4  ;;  %s115_s18 = int_to_ptr.vmem [resolvable:$true] %s114_s18 }
   0x6   :  { %s138_s19 = scalar_lea.vmem %s115_s18, 128  ;;  %p143_p1 = scmp.lt.s32.totalorder %s115_s18, %s115_s18 }
   0x7   :  { %v25_v9 = vadd.f32 %v24_v8, %v23_v6  ;;  %p139_p0 = scmp.ne.s32.totalorder %s115_s18, %s138_s19  ;;  %p144_p2 = scmp.lt.s32.totalorder %s138_s19, %s138_s19 }
   0x9   :  { %v26_v10 = vrot.slane %v25_v9, 2  ;;  %p145_p3 = por %p144_p2, %p143_p1 }
   0xb   :  { %v27_v11 = vadd.f32 %v26_v10, %v25_v9  ;;  %p146_p4 = pnand %p145_p3, %p139_p0 }
   0xd   :  { %v28_v12 = vrot.slane %v27_v11, 1 }
   0xf   :  { %v29_v13 = vadd.f32 %v28_v12, %v27_v11 }
  0x11   :  { %v31_v14 = vmul.f32 0.0625, %v29_v13 }
  0x13   :  { %v32_v15 = vsub.f32 %v16_v0, %v31_v14  ;;  %v33_v16 = vsub.f32 %v17_v1, %v31_v14 }
  0x15   :  { %v34_v17 = vmul.f32 %v32_v15, %v32_v15  ;;  %v35_v18 = vmul.f32 %v33_v16, %v33_v16  ;;  %v55_v19 = vpack.c.bf16 %v33_v16, %v32_v15 }
  0x17   :  { %v36_v20 = vsel %vm20_vm0, %v34_v17, 0.0  ;;  %v37_v21 = vsel %vm20_vm0, %v35_v18, 0.0  ;;  %126 = vmatpush3.bf16.msra.mxu0 %v55_v19 }
  0x18   :  { %v38_v23 = vadd.f32 %v37_v21, %v36_v20 }
  0x1a   :  { %128 = vmatmul.mubr.msk.bf16.vlgmr.msra.gmra.mrb[0].mxu0 %vm62_vm2, %v18_v22  ;;  %v39_v24 = vrot.slane %v38_v23, 4 }
  0x1c   :  { %v40_v25 = vadd.f32 %v39_v24, %v38_v23 }
  0x1e   :  { %v41_v26 = vrot.slane %v40_v25, 2 }
  0x20   :  { %v42_v27 = vadd.f32 %v41_v26, %v40_v25 }
  0x22   :  { %v43_v28 = vrot.slane %v42_v27, 1 }
  0x24   :  { %v44_v29 = vadd.f32 %v43_v28, %v42_v27 }
  0x26   :  { %v46_v30 = vmul.f32 0.06666667, %v44_v29 }
  0x28   :  { %v47_v31 = vadd.f32 1e-05, %v46_v30 }
  0x2a   :  { %136 = vrsqrt.f32 %v47_v31  ;;  %vm50_vm3 = vcmp.eq.f32.partialorder %v47_v31, inf  ;;  %v53_v34 = vand.u32 2147483648, %v47_v31  ;;  %vm52_vm4 = vcmp.eq.f32.partialorder %v47_v31, 0.0 }
  0x34   :  { %v137_v32 = vpop.eup %136 }
  0x35   :  { %v49_v33 = vmul.f32 %v137_v32, %v47_v31 }
  0x37   :  { %v51_v35 = vsel %vm50_vm3, %v47_v31, %v49_v33 }
  0x38   :  { %v54_v37 = vsel %vm52_vm4, %v53_v34, %v51_v35 }
  0x83   :  { %v59_v36 = vpop.permute.xlu0 %58 }
  0x84   :  { %v61_v38 = vmul.f32 %v59_v36, %v54_v37 }
  0xed   :  { %v100_v39 = vpop.f32.mrb[0].mxu0 }
  0xee   :  { %v101_v40 = vadd.f32 %v100_v39, %v61_v38  ;;  %v129_v41 = vpop.f32.mrb[1].mxu0 }
  0xef   :  { %v103_v42 = vpop.f32.mrb[2].mxu0 }
  0xf0   :  { %v106_v43 = vadd.f32 %v101_v40, %v31_v14  ;;  %v130_v44 = vpop.f32.mrb[3].mxu0 }
  0xf2   :  { %107 = vst.msk [vmem:[#allocation2] sm:$0xff] %vm20_vm0, %v106_v43 }
  0xf3   :  { %149 = shalt.err (!%p146_p4)
}
  0xf4   :  { %s150_s22 = scalar_lea.hbm %s218_s3, 128 }
  0xf5   :  { %p151_p5 = scmp.ne.s32.totalorder %s218_s3, %s150_s22  ;;  %p154_p6 = scmp.lt.u32.totalorder %s150_s22, %s218_s3 }
  0xf7   :  { %p156_p7 = pnand %p154_p6, %p151_p5 }
  0xf9   :  { %159 = shalt.err (!%p156_p7)
}
  0xfa   :  { %117 = dma.vmem_to_hbm [thread:$0]  %s115_s18, 128, %s218_s3, [#allocation3]  }
  0xfb   :  { %160 = dma.done.wait [#allocation3], 128  }
  0xfc   :  { %161 = vsyncadd [#allocation3], 4294967168 }
  0xfd   :  { %121 = vsyncpa [#allocation3], 1 }

</bundles_post_ra>
